<compile_context>
chip_gen: v7x
topology: tpu7x:2x2x1
jax: 0.10.0
libtpu: 0.0.40
codegen_flags: <defaults>
</compile_context>

<pallas_src>
import functools

import jax
import jax.numpy as jnp
from jax import lax
from jax.experimental import pallas as pl
from jax.experimental.pallas import tpu as pltpu


def _batch_loss_kernel(params_ref, w_ref, close_ref, out_ref,
                       sum_log_ref, prev_cash_ref, prev_assets_ref,
                       *, batch, tile_b):
    i = pl.program_id(0)
    cr = params_ref[0]          # commission_ratio  (SMEM scalar)
    ir = params_ref[1]          # interest_rate     (SMEM scalar)

    @pl.when(i == 0)
    def _():
        sum_log_ref[...] = jnp.zeros_like(sum_log_ref)
        prev_cash_ref[...] = jnp.zeros_like(prev_cash_ref)
        prev_assets_ref[...] = jnp.zeros_like(prev_assets_ref)

    w = w_ref[...]                       # [TB, A]    portfolio weights
    close = close_ref[...]               # [TB, A-1]  close-price ratios
    w_cash = w[:, 0:1]                   # [TB, 1]
    w_assets = w[:, 1:]                  # [TB, A-1]

    # element_reward = w * cpr, with cpr = 1 for the cash column.
    er_cash = w_cash                                            # [TB, 1]
    er_assets = w_assets * close                                # [TB, A-1]

    reward0 = er_cash + jnp.sum(er_assets, axis=1, keepdims=True)   # [TB, 1]

    # interest: only negative element rewards contribute, scaled by the rate.
    interest = ir * (jnp.minimum(er_cash, 0.0)
                     + jnp.sum(jnp.minimum(er_assets, 0.0), axis=1, keepdims=True))

    # future_omega = element_reward / reward   (exact divide for parity)
    fo_cash = er_cash / reward0                                  # [TB, 1]
    fo_assets = er_assets / reward0                              # [TB, A-1]

    # pure_pc[b] = 1 - c * sum_a |future_omega[b-1, a] - w[b, a]|  (global b >= 1)
    # pure_pc[0] = 1.  Row shift within the tile via sublane roll; tile seam
    # (local row 0) comes from the previous tile's carried last row.
    fo_cash_prev = pltpu.roll(fo_cash, shift=1, axis=0)          # row b <- b-1
    fo_assets_prev = pltpu.roll(fo_assets, shift=1, axis=0)
    row1 = lax.broadcasted_iota(jnp.int32, fo_cash.shape, 0)     # [TB, 1]
    rowm = lax.broadcasted_iota(jnp.int32, fo_assets.shape, 0)   # [TB, A-1]
    fo_cash_prev = jnp.where(row1 == 0, prev_cash_ref[...], fo_cash_prev)
    fo_assets_prev = jnp.where(rowm == 0, prev_assets_ref[...], fo_assets_prev)

    turnover = (jnp.abs(fo_cash_prev - w_cash)
                + jnp.sum(jnp.abs(fo_assets_prev - w_assets), axis=1, keepdims=True))
    grow = i * tile_b + row1                                     # global row index
    pure_pc = jnp.where(grow == 0, 1.0, 1.0 - cr * turnover)     # [TB, 1]

    reward = reward0 * pure_pc + interest                        # [TB, 1]

    # Accumulate sum(log(reward)) over valid rows only (ragged last tile).
    valid = grow < batch
    log_r = jnp.where(valid, jnp.log(reward), 0.0)
    sum_log_ref[...] += jnp.sum(log_r, axis=0, keepdims=True)

    # Seam carry for the next tile: this tile's last future_omega row.
    prev_cash_ref[...] = fo_cash[tile_b - 1:tile_b, :]
    prev_assets_ref[...] = fo_assets[tile_b - 1:tile_b, :]

    @pl.when(i == pl.num_programs(0) - 1)
    def _():
        sum_log = sum_log_ref[...]                               # [1, 1]
        loss = sum_log * (-1.0 / batch)                          # mean(-log(reward))
        # portfolio_value = prod(reward) computed as exp(sum(log(reward)));
        # identical for reward > 0 (always true for sane portfolio inputs).
        pv = jnp.exp(sum_log)
        lane = lax.broadcasted_iota(jnp.int32, out_ref.shape, 1)
        out_ref[...] = jnp.where(lane == 0, loss, pv)


_TB_CAP = 2048  # rows per batch tile (multiple of 8); tiny VMEM footprint


@jax.jit
def batch_loss_forward(w, y, commission_ratio=0.0025, interest_rate=0.02 / 250):
    """Pallas implementation of Batch_Loss.forward. Returns (loss, portfolio_value)."""
    w = jnp.asarray(w, jnp.float32)
    y = jnp.asarray(y, jnp.float32)
    B, one, A = w.shape
    M = A - 1
    assert one == 1 and y.shape[0] == B and y.shape[1] == M

    # Glue fused into this jit region: drop the singleton dim of w and slice
    # feature 0 of y.  No lane padding, no cash-column concat (done in-kernel).
    w2d = w[:, 0, :]                       # [B, A]
    close = y[:, :, 0]                     # [B, M]
    params = jnp.stack([jnp.asarray(commission_ratio, jnp.float32),
                        jnp.asarray(interest_rate, jnp.float32)])   # [2] SMEM scalars

    tb = B if B <= _TB_CAP else _TB_CAP    # full-array block (exempt) or 8-aligned tile
    nb = pl.cdiv(B, tb)

    kernel = functools.partial(_batch_loss_kernel, batch=B, tile_b=tb)

    out = pl.pallas_call(
        kernel,
        out_shape=jax.ShapeDtypeStruct((1, 128), jnp.float32),
        grid=(nb,),
        in_specs=[
            pl.BlockSpec(memory_space=pltpu.MemorySpace.SMEM),        # params
            pl.BlockSpec((tb, A), lambda i: (i, 0)),                  # w
            pl.BlockSpec((tb, M), lambda i: (i, 0)),                  # close ratios
        ],
        out_specs=pl.BlockSpec((1, 128), lambda i: (0, 0)),
        scratch_shapes=[
            pltpu.VMEM((1, 1), jnp.float32),   # sum of log(reward)
            pltpu.VMEM((1, 1), jnp.float32),   # seam: prev future_omega (cash)
            pltpu.VMEM((1, M), jnp.float32),   # seam: prev future_omega (assets)
        ],
        compiler_params=pltpu.CompilerParams(
            dimension_semantics=("arbitrary",)),
    )(params, w2d, close)
    return out[0, 0], out[0, 1]


def batch_loss_reference(w, y, commission_ratio, interest_rate):
    """Pure-JAX transliteration of the PyTorch forward (for verification)."""
    w = jnp.asarray(w, jnp.float32)
    y = jnp.asarray(y, jnp.float32)
    B = w.shape[0]
    close = y[:, :, 0:1]                                             # [B, M, 1]
    cpr = jnp.concatenate([jnp.ones((B, 1, 1), jnp.float32), close], axis=1)  # [B, A, 1]
    reward = jnp.matmul(w, cpr)                                      # [B, 1, 1]
    cpr_t = jnp.reshape(cpr, (B, 1, -1))                             # [B, 1, A]
    er = w * cpr_t
    interest = jnp.sum(jnp.where(er < 0, er, 0.0), axis=2, keepdims=True) * interest_rate
    fo = er / reward
    wt, wt1 = fo[:-1], w[1:]
    pure_pc = 1.0 - jnp.sum(jnp.abs(wt - wt1), -1) * commission_ratio      # [B-1, 1]
    pure_pc = jnp.concatenate([jnp.ones((1, 1), jnp.float32), pure_pc], 0)  # [B, 1]
    pure_pc = jnp.reshape(pure_pc, (B, 1, 1))
    reward = reward * pure_pc + interest
    pv = jnp.prod(reward, axis=0)                                    # [1, 1]
    loss = jnp.mean(-jnp.log(reward))
    return loss, pv[0, 0]


if __name__ == "__main__":
    key = jax.random.PRNGKey(0)
    k1, k2 = jax.random.split(key)

    B, M, F = 8, 4, 3        # batch, assets, features  -> A = M + 1 (with cash)
    A = M + 1
    commission_ratio = 0.0025
    interest_rate = 0.02 / 250

    # Positive, normalized portfolio weights and close-price ratios near 1.
    w = jax.nn.softmax(jax.random.normal(k1, (B, 1, A)), axis=-1).astype(jnp.float32)
    y = (1.0 + 0.01 * jax.random.normal(k2, (B, M, F))).astype(jnp.float32)

    loss, pv = batch_loss_forward(w, y, commission_ratio, interest_rate)
    (loss, pv) = jax.block_until_ready((loss, pv))

    loss_ref, pv_ref = batch_loss_reference(w, y, commission_ratio, interest_rate)
    assert jnp.allclose(loss, loss_ref, rtol=1e-5, atol=1e-6), (loss, loss_ref)
    assert jnp.allclose(pv, pv_ref, rtol=1e-5, atol=1e-6), (pv, pv_ref)

    print("KERNEL_OK")
</pallas_src>

<mosaic_0001>
module attributes {stable_mosaic.version = 11 : i64} {
  func.func @_batch_loss_kernel(%arg0: i32, %arg1: memref<2xf32, #tpu.memory_space<smem>>, %arg2: memref<8x5xf32, #tpu.memory_space<vmem>>, %arg3: memref<8x4xf32, #tpu.memory_space<vmem>>, %arg4: memref<1x128xf32, #tpu.memory_space<vmem>>, %arg5: memref<1x1xf32, #tpu.memory_space<vmem>>, %arg6: memref<1x1xf32, #tpu.memory_space<vmem>>, %arg7: memref<1x4xf32, #tpu.memory_space<vmem>>) attributes {dimension_semantics = [#tpu.dimension_semantics<arbitrary>], iteration_bounds = array<i64: 1>, scalar_prefetch = 0 : i64, scratch_operands = 3 : i64, tpu.core_type = #tpu.core_type<tc>, window_params = [{transform_indices = @transform_0, window_bounds = array<i64: 2>}, {transform_indices = @transform_1, window_bounds = array<i64: 8, 5>}, {transform_indices = @transform_2, window_bounds = array<i64: 8, 4>}, {pipeline_mode = #tpu.pipeline_mode<synchronous>, transform_indices = @transform_3, window_bounds = array<i64: 1, 128>}]} {
    %c0 = arith.constant 0 : index
    %0 = memref.load %arg1[%c0] : memref<2xf32, #tpu.memory_space<smem>>
    %c1 = arith.constant 1 : index
    %1 = memref.load %arg1[%c1] : memref<2xf32, #tpu.memory_space<smem>>
    %c0_i32 = arith.constant 0 : i32
    %2 = arith.cmpi eq, %arg0, %c0_i32 : i32
    %3 = arith.extui %2 : i1 to i32
    %c0_i32_0 = arith.constant 0 : i32
    %4 = arith.cmpi ne, %3, %c0_i32_0 : i32
    scf.if %4 {
      %cst_32 = arith.constant 0.000000e+00 : f32
      %78 = vector.broadcast %cst_32 : f32 to vector<1x1xf32>
      %c0_33 = arith.constant 0 : index
      %c0_34 = arith.constant 0 : index
      %79 = vector.load %arg5[%c0_33, %c0_34] : memref<1x1xf32, #tpu.memory_space<vmem>>, vector<1x1xf32>
      tpu.vector_store %arg5[%c0_33, %c0_34], %78 {strides = array<i32>} : memref<1x1xf32, #tpu.memory_space<vmem>>, vector<1x1xf32>,
      %cst_35 = arith.constant 0.000000e+00 : f32
      %80 = vector.broadcast %cst_35 : f32 to vector<1x1xf32>
      %c0_36 = arith.constant 0 : index
      %c0_37 = arith.constant 0 : index
      %81 = vector.load %arg6[%c0_36, %c0_37] : memref<1x1xf32, #tpu.memory_space<vmem>>, vector<1x1xf32>
      tpu.vector_store %arg6[%c0_36, %c0_37], %80 {strides = array<i32>} : memref<1x1xf32, #tpu.memory_space<vmem>>, vector<1x1xf32>,
      %cst_38 = arith.constant 0.000000e+00 : f32
      %82 = vector.broadcast %cst_38 : f32 to vector<1x4xf32>
      %c0_39 = arith.constant 0 : index
      %c0_40 = arith.constant 0 : index
      %83 = vector.load %arg7[%c0_39, %c0_40] : memref<1x4xf32, #tpu.memory_space<vmem>>, vector<1x4xf32>
      tpu.vector_store %arg7[%c0_39, %c0_40], %82 {strides = array<i32>} : memref<1x4xf32, #tpu.memory_space<vmem>>, vector<1x4xf32>,
    } else {
    }
    %c0_1 = arith.constant 0 : index
    %c0_2 = arith.constant 0 : index
    %5 = vector.load %arg2[%c0_1, %c0_2] : memref<8x5xf32, #tpu.memory_space<vmem>>, vector<8x5xf32>
    %c0_3 = arith.constant 0 : index
    %c0_4 = arith.constant 0 : index
    %6 = vector.load %arg3[%c0_3, %c0_4] : memref<8x4xf32, #tpu.memory_space<vmem>>, vector<8x4xf32>
    %7 = vector.extract_strided_slice %5 {offsets = [0, 0], sizes = [8, 1], strides = [1, 1]} : vector<8x5xf32> to vector<8x1xf32>
    %8 = vector.extract_strided_slice %5 {offsets = [0, 1], sizes = [8, 4], strides = [1, 1]} : vector<8x5xf32> to vector<8x4xf32>
    %9 = arith.mulf %8, %6 : vector<8x4xf32>
    %cst = arith.constant dense<0.000000e+00> : vector<8xf32>
    %10 = vector.multi_reduction <add>, %9, %cst [1] : vector<8x4xf32> to vector<8xf32>
    %11 = vector.shape_cast %10 : vector<8xf32> to vector<8x1xf32>
    %12 = arith.addf %7, %11 : vector<8x1xf32>
    %cst_5 = arith.constant 0.000000e+00 : f32
    %13 = vector.broadcast %cst_5 : f32 to vector<8x1xf32>
    %14 = arith.minimumf %7, %13 : vector<8x1xf32>
    %cst_6 = arith.constant 0.000000e+00 : f32
    %15 = vector.broadcast %cst_6 : f32 to vector<8x4xf32>
    %16 = arith.minimumf %9, %15 : vector<8x4xf32>
    %cst_7 = arith.constant dense<0.000000e+00> : vector<8xf32>
    %17 = vector.multi_reduction <add>, %16, %cst_7 [1] : vector<8x4xf32> to vector<8xf32>
    %18 = vector.shape_cast %17 : vector<8xf32> to vector<8x1xf32>
    %19 = arith.addf %14, %18 : vector<8x1xf32>
    %20 = vector.broadcast %1 : f32 to vector<8x1xf32>
    %21 = arith.mulf %20, %19 : vector<8x1xf32>
    %22 = arith.divf %7, %12 : vector<8x1xf32>
    %23 = vector.broadcast %12 : vector<8x1xf32> to vector<8x4xf32>
    %24 = arith.divf %9, %23 : vector<8x4xf32>
    %c1_i32 = arith.constant 1 : i32
    %25 = tpu.dynamic_rotate %22 by %c1_i32 dim 0 : vector<8x1xf32>, i32 -> vector<8x1xf32>
    %c1_i32_8 = arith.constant 1 : i32
    %26 = tpu.dynamic_rotate %24 by %c1_i32_8 dim 0 : vector<8x4xf32>, i32 -> vector<8x4xf32>
    %27 = tpu.iota {dimensions = array<i32: 0>} : vector<8x1xi32>
    %28 = tpu.iota {dimensions = array<i32: 0>} : vector<8x4xi32>
    %c0_i32_9 = arith.constant 0 : i32
    %29 = vector.broadcast %c0_i32_9 : i32 to vector<8x1xi32>
    %30 = arith.cmpi eq, %27, %29 : vector<8x1xi32>
    %c0_10 = arith.constant 0 : index
    %c0_11 = arith.constant 0 : index
    %31 = vector.load %arg6[%c0_10, %c0_11] : memref<1x1xf32, #tpu.memory_space<vmem>>, vector<1x1xf32>
    %32 = vector.shape_cast %31 : vector<1x1xf32> to vector<1x1xf32>
    %33 = vector.broadcast %32 : vector<1x1xf32> to vector<8x1xf32>
    %34 = arith.select %30, %33, %25 : vector<8x1xi1>, vector<8x1xf32>
    %c0_i32_12 = arith.constant 0 : i32
    %35 = vector.broadcast %c0_i32_12 : i32 to vector<8x4xi32>
    %36 = arith.cmpi eq, %28, %35 : vector<8x4xi32>
    %c0_13 = arith.constant 0 : index
    %c0_14 = arith.constant 0 : index
    %37 = vector.load %arg7[%c0_13, %c0_14] : memref<1x4xf32, #tpu.memory_space<vmem>>, vector<1x4xf32>
    %38 = vector.shape_cast %37 : vector<1x4xf32> to vector<1x4xf32>
    %39 = vector.broadcast %38 : vector<1x4xf32> to vector<8x4xf32>
    %40 = arith.select %36, %39, %26 : vector<8x4xi1>, vector<8x4xf32>
    %41 = arith.subf %34, %7 : vector<8x1xf32>
    %42 = math.absf %41 : vector<8x1xf32>
    %43 = arith.subf %40, %8 : vector<8x4xf32>
    %44 = math.absf %43 : vector<8x4xf32>
    %cst_15 = arith.constant dense<0.000000e+00> : vector<8xf32>
    %45 = vector.multi_reduction <add>, %44, %cst_15 [1] : vector<8x4xf32> to vector<8xf32>
    %46 = vector.shape_cast %45 : vector<8xf32> to vector<8x1xf32>
    %47 = arith.addf %42, %46 : vector<8x1xf32>
    %c8_i32 = arith.constant 8 : i32
    %48 = arith.muli %arg0, %c8_i32 : i32
    %49 = vector.broadcast %48 : i32 to vector<8x1xi32>
    %50 = arith.addi %49, %27 : vector<8x1xi32>
    %c0_i32_16 = arith.constant 0 : i32
    %51 = vector.broadcast %c0_i32_16 : i32 to vector<8x1xi32>
    %52 = arith.cmpi eq, %50, %51 : vector<8x1xi32>
    %53 = vector.broadcast %0 : f32 to vector<8x1xf32>
    %54 = arith.mulf %53, %47 : vector<8x1xf32>
    %cst_17 = arith.constant 1.000000e+00 : f32
    %55 = vector.broadcast %cst_17 : f32 to vector<8x1xf32>
    %56 = arith.subf %55, %54 : vector<8x1xf32>
    %cst_18 = arith.constant 1.000000e+00 : f32
    %57 = vector.broadcast %cst_18 : f32 to vector<8x1xf32>
    %58 = arith.select %52, %57, %56 : vector<8x1xi1>, vector<8x1xf32>
    %59 = arith.mulf %12, %58 : vector<8x1xf32>
    %60 = arith.addf %59, %21 : vector<8x1xf32>
    %c8_i32_19 = arith.constant 8 : i32
    %61 = vector.broadcast %c8_i32_19 : i32 to vector<8x1xi32>
    %62 = arith.cmpi slt, %50, %61 : vector<8x1xi32>
    %63 = math.log %60 : vector<8x1xf32>
    %cst_20 = arith.constant 0.000000e+00 : f32
    %64 = vector.broadcast %cst_20 : f32 to vector<8x1xf32>
    %65 = arith.select %62, %63, %64 : vector<8x1xi1>, vector<8x1xf32>
    %c0_21 = arith.constant 0 : index
    %c0_22 = arith.constant 0 : index
    %66 = vector.load %arg5[%c0_21, %c0_22] : memref<1x1xf32, #tpu.memory_space<vmem>>, vector<1x1xf32>
    %cst_23 = arith.constant dense<0.000000e+00> : vector<1xf32>
    %67 = vector.multi_reduction <add>, %65, %cst_23 [0] : vector<8x1xf32> to vector<1xf32>
    %68 = vector.shape_cast %67 : vector<1xf32> to vector<1x1xf32>
    %69 = arith.addf %66, %68 : vector<1x1xf32>
    %c0_24 = arith.constant 0 : index
    %c0_25 = arith.constant 0 : index
    %70 = vector.load %arg5[%c0_24, %c0_25] : memref<1x1xf32, #tpu.memory_space<vmem>>, vector<1x1xf32>
    tpu.vector_store %arg5[%c0_24, %c0_25], %69 {strides = array<i32>} : memref<1x1xf32, #tpu.memory_space<vmem>>, vector<1x1xf32>,
    %71 = vector.extract_strided_slice %22 {offsets = [7, 0], sizes = [1, 1], strides = [1, 1]} : vector<8x1xf32> to vector<1x1xf32>
    %c0_26 = arith.constant 0 : index
    %c0_27 = arith.constant 0 : index
    %72 = vector.load %arg6[%c0_26, %c0_27] : memref<1x1xf32, #tpu.memory_space<vmem>>, vector<1x1xf32>
    tpu.vector_store %arg6[%c0_26, %c0_27], %71 {strides = array<i32>} : memref<1x1xf32, #tpu.memory_space<vmem>>, vector<1x1xf32>,
    %73 = vector.extract_strided_slice %24 {offsets = [7, 0], sizes = [1, 4], strides = [1, 1]} : vector<8x4xf32> to vector<1x4xf32>
    %c0_28 = arith.constant 0 : index
    %c0_29 = arith.constant 0 : index
    %74 = vector.load %arg7[%c0_28, %c0_29] : memref<1x4xf32, #tpu.memory_space<vmem>>, vector<1x4xf32>
    tpu.vector_store %arg7[%c0_28, %c0_29], %73 {strides = array<i32>} : memref<1x4xf32, #tpu.memory_space<vmem>>, vector<1x4xf32>,
    %c0_i32_30 = arith.constant 0 : i32
    %75 = arith.cmpi eq, %arg0, %c0_i32_30 : i32
    %76 = arith.extui %75 : i1 to i32
    %c0_i32_31 = arith.constant 0 : i32
    %77 = arith.cmpi ne, %76, %c0_i32_31 : i32
    scf.if %77 {
      %c0_32 = arith.constant 0 : index
      %c0_33 = arith.constant 0 : index
      %78 = vector.load %arg5[%c0_32, %c0_33] : memref<1x1xf32, #tpu.memory_space<vmem>>, vector<1x1xf32>
      %cst_34 = arith.constant -1.250000e-01 : f32
      %79 = vector.broadcast %cst_34 : f32 to vector<1x1xf32>
      %80 = arith.mulf %78, %79 : vector<1x1xf32>
      %81 = math.exp %78 : vector<1x1xf32>
      %82 = tpu.iota {dimensions = array<i32: 1>} : vector<1x128xi32>
      %c0_i32_35 = arith.constant 0 : i32
      %83 = vector.broadcast %c0_i32_35 : i32 to vector<1x128xi32>
      %84 = arith.cmpi eq, %82, %83 : vector<1x128xi32>
      %85 = vector.shape_cast %80 : vector<1x1xf32> to vector<1x1xf32>
      %86 = vector.broadcast %85 : vector<1x1xf32> to vector<1x128xf32>
      %87 = vector.shape_cast %81 : vector<1x1xf32> to vector<1x1xf32>
      %88 = vector.broadcast %87 : vector<1x1xf32> to vector<1x128xf32>
      %89 = arith.select %84, %86, %88 : vector<1x128xi1>, vector<1x128xf32>
      %c0_36 = arith.constant 0 : index
      %c0_37 = arith.constant 0 : index
      %90 = vector.load %arg4[%c0_36, %c0_37] : memref<1x128xf32, #tpu.memory_space<vmem>>, vector<1x128xf32>
      tpu.vector_store %arg4[%c0_36, %c0_37], %89 {strides = array<i32>} : memref<1x128xf32, #tpu.memory_space<vmem>>, vector<1x128xf32>,
    } else {
    }
    return
  }
  func.func @transform_0(%arg0: i32) -> i32 {
    %c0_i32 = arith.constant 0 : i32
    %c0_i32_0 = arith.constant 0 : i32
    return %c0_i32 : i32
  }
  func.func @transform_1(%arg0: i32) -> (i32, i32) {
    %c0_i32 = arith.constant 0 : i32
    %c0_i32_0 = arith.constant 0 : i32
    return %arg0, %c0_i32 : i32, i32
  }
  func.func @transform_2(%arg0: i32) -> (i32, i32) {
    %c0_i32 = arith.constant 0 : i32
    %c0_i32_0 = arith.constant 0 : i32
    return %arg0, %c0_i32 : i32, i32
  }
  func.func @transform_3(%arg0: i32) -> (i32, i32) {
    %c0_i32 = arith.constant 0 : i32
    %c0_i32_0 = arith.constant 0 : i32
    %c0_i32_1 = arith.constant 0 : i32
    return %c0_i32, %c0_i32_0 : i32, i32
  }
}

</mosaic_0001>

<bundles_post_ra>
// kernel: batch_loss_forward.1
= control target key start
LH: loop header
LB: loop body
LE: loop exit
PB: predicated region body
PF: predicated region fallthrough
CT: control target
= control target key end

     0   :  { %8 = vsyncpa [#allocation6], 0  ;;  %s276_s0 = inlined_call_operand.vmem [shape: f32[2], index: 0, kind: input, shape index: {}]   ;;  %s277_s1 = inlined_call_operand.vmem [shape: f32[8,5], index: 1, kind: input, shape index: {}]   ;;  %s278_s2 = inlined_call_operand.vmem [shape: f32[8,4], index: 2, kind: input, shape index: {}]   ;;  %s279_s3 = inlined_call_operand.vmem [shape: f32[1,128], index: 3, kind: output, shape index: {}]  }
   0x1   :  { %s15_s14 = sshll.u32 %s276_s0, 4  ;;  %s16_s14 = int_to_ptr.vmem [resolvable:$true] %s15_s14 }
   0x2   :  { %s195_s15 = scalar_lea.vmem %s16_s14, 16  ;;  %p200_p1 = scmp.lt.s32.totalorder %s16_s14, %s16_s14 }
   0x3   :  { %p196_p0 = scmp.ne.s32.totalorder %s16_s14, %s195_s15  ;;  %p201_p2 = scmp.lt.s32.totalorder %s195_s15, %s195_s15 }
   0x5   :  { %p202_p3 = por %p201_p2, %p200_p1 }
   0x7   :  { %p203_p4 = pnand %p202_p3, %p196_p0 }
   0x9   :  { %206 = shalt.err (!%p203_p4)
}
   0xa   :  { %s209_s16 = smov [#allocation5]  }
   0xb   :  { %18 = dma.vmem_to_smem %s16_s14, 16, %s209_s16, [#allocation6]  }
   0xc   :  { %207 = dma.done.wait [#allocation6], 16  }
   0xd   :  { %208 = vsyncadd [#allocation6], 4294967280 }
   0xe   :  { %26 = sfence }
   0xf   :  { %v39_v0 = vld [vmem:[%s278_s2] sm:$0xff]  ;;  %s210_s19 = smov 1   ;;  %s211_s21 = smov 127   ;;  %vm49_vm0 = vcmask 31744   ;;  %v212_v6 = vmov 0   ;;  %vm33_vm1 = vcmask 0   ;;  %v81_v10 = vlaneseq }
  0x10   :  { %41 = vrot.lane.b32.xlu0 %v39_v0, %s210_s19  ;;  %v243_v1 = vld [vmem:[%s277_s1] sm:$0xff]  ;;  %185 = vset.pattern.permute.xlu1 %v212_v6  ;;  %v213_v7 = vmov 0.0   ;;  %vm138_vm2 = vcmask 7175   ;;  %vm36_vm4 = vcmask 24576   ;;  %vm140_vm5 = vcmask 31751   ;;  %s27_s1 = sld [smem:[#allocation5]] }
  0x11   :  { %186 = vset.pattern.permute.xlu0 %v212_v6  ;;  %34 = vst.msk [vmem:[#allocation2] sm:$0x1] %vm33_vm1, %v213_v7  ;;  %35 = vst.msk [vmem:[#allocation3] sm:$0x1] %vm33_vm1, %v213_v7  ;;  %v252_v11 = vshrl.u32 %v81_v10, 7  ;;  %s177_s2 = sld [smem:[#allocation5 + $0x1]] }
  0x12   :  { %37 = vst.msk [vmem:[#allocation4] sm:$0x1] %vm36_vm4, %v213_v7  ;;  %v54_v33 = vmin.f32 %v243_v1, 0.0  ;;  %vm127_vm6 = vcmask 7168   ;;  %v150_v61 = vand.u32 127, %v81_v10 }
  0x13   :  { %vm83_vm3 = vcmp.eq.s32.totalorder %v252_v11, 0  ;;  %v159_v62 = vsub.s32 0, %v252_v11 }
  0x14   :  { %vm151_vm7 = vcmp.eq.s32.totalorder %v150_v61, 0 }
  0x16   :  { %v116_v35 = vstv %s27_s1 }
  0x17   :  { %v64_v40 = vstv %s177_s2 }
  0x18   :  { %v178_v13 = vld [vmem:[#allocation3] ss:$0 sm:$0xff]  ;;  %v126_v54 = vld [vmem:[#allocation2] sm:$0x1] }
  0x19   :  { %v179_v21 = vld [vmem:[#allocation4] ss:$0 sm:$0xff] }
  0x82   :  { %v42_v2 = vpop.permute.xlu0 %41 }
  0x83   :  { %v44_v3 = vmul.f32 %v42_v2, %v243_v1 }
  0x85   :  { %46 = vrot.lane.b32.xlu0 %v44_v3, %s211_s21  ;;  %v55_v20 = vmin.f32 %v44_v3, 0.0 }
  0xf7   :  { %v47_v4 = vpop.permute.xlu0 %46 }
  0xf8   :  { %v50_v5 = vsel %vm49_vm0, %v47_v4, 0.0 }
  0xf9   :  { %51 = vadd.xlane.f32.xlu1 %v50_v5 }
 0x186   :  { %v52_v8 = vpop.xlane.xlu1 %51 }
 0x187   :  { %v53_v9 = vadd.f32 %v52_v8, %v243_v1 }
 0x189   :  { %187 = vrcp.f32 %v53_v9  ;;  %70 = vperm.xlu1 %185, %v53_v9  }
 0x193   :  { %v188_v12 = vpop.eup %187 }
 0x194   :  { %v67_v14 = vmul.f32 %v188_v12, %v243_v1 }
 0x196   :  { %v75_v15 = vrot.slane %v67_v14, 7  ;;  %139 = vst.msk [vmem:[#allocation3 - $0x7] sm:$0x80] %vm138_vm2, %v67_v14 }
 0x198   :  { %v91_v16 = vsel %vm83_vm3, %v178_v13, %v75_v15 }
 0x199   :  { %v100_v31 = vsub.f32 %v91_v16, %v243_v1 }
 0x19b   :  { %v101_v32 = vand.u32 2147483647, %v100_v31 }
 0x208   :  { %v71_v17 = vpop.permute.xlu1 %70 }
 0x209   :  { %189 = vrcp.f32 %v71_v17 }
 0x213   :  { %v190_v18 = vpop.eup %189 }
 0x214   :  { %v74_v19 = vmul.f32 %v190_v18, %v44_v3 }
 0x216   :  { %77 = vrot.lane.b32.xlu0 %v74_v19, %s211_s21 }
 0x21a   :  { %103 = vrot.lane.b32.xlu0 %v243_v1, %s211_s21 }
 0x21e   :  { %57 = vrot.lane.b32.xlu0 %v55_v20, %s211_s21 }
 0x288   :  { %v78_v22 = vpop.permute.xlu0 %77 }
 0x289   :  { %v80_v23 = vrot.slane %v78_v22, 7  ;;  %141 = vst.msk [vmem:[#allocation4 - $0x7] sm:$0x80] %vm140_vm5, %v78_v22 }
 0x28b   :  { %v99_v24 = vsel %vm83_vm3, %v179_v21, %v80_v23 }
 0x28c   :  { %v104_v25 = vpop.permute.xlu0 %103 }
 0x28d   :  { %v106_v26 = vsub.f32 %v99_v24, %v104_v25 }
 0x28f   :  { %v107_v27 = vand.u32 2147483647, %v106_v26 }
 0x290   :  { %v58_v28 = vpop.permute.xlu0 %57 }
 0x291   :  { %v60_v29 = vsel %vm49_vm0, %v58_v28, 0.0  ;;  %v108_v30 = vsel %vm49_vm0, %v107_v27, 0.0 }
 0x292   :  { %61 = vadd.xlane.f32.xlu1 %v60_v29  ;;  %109 = vadd.xlane.f32.xlu0 %v108_v30 }
 0x31f   :  { %v110_v34 = vpop.xlane.xlu0 %109  ;;  %v62_v36 = vpop.xlane.xlu1 %61 }
 0x320   :  { %v111_v37 = vadd.f32 %v110_v34, %v101_v32  ;;  %v63_v39 = vadd.f32 %v62_v36, %v54_v33 }
 0x322   :  { %v117_v38 = vmul.f32 %v116_v35, %v111_v37  ;;  %v65_v43 = vmul.f32 %v64_v40, %v63_v39 }
 0x324   :  { %v118_v41 = vsub.f32 1.0, %v117_v38 }
 0x326   :  { %v119_v42 = vsel %vm83_vm3, 1.0, %v118_v41 }
 0x327   :  { %v120_v44 = vmul.f32 %v119_v42, %v53_v9 }
 0x329   :  { %v121_v45 = vadd.f32 %v120_v44, %v65_v43 }
 0x32b   :  { %191 = vlog2.f32 %v121_v45 }
 0x335   :  { %v192_v46 = vpop.eup %191 }
 0x336   :  { %v124_v47 = vmul.f32 0.6931472, %v192_v46 }
 0x338   :  { %v128_v48 = vsel %vm127_vm6, %v124_v47, 0.0 }
 0x339   :  { %v129_v49 = vrot.slane %v128_v48, 4 }
 0x33b   :  { %v130_v50 = vadd.f32 %v129_v49, %v128_v48 }
 0x33d   :  { %v131_v51 = vrot.slane %v130_v50, 2 }
 0x33f   :  { %v132_v52 = vadd.f32 %v131_v51, %v130_v50 }
 0x341   :  { %v133_v53 = vrot.slane %v132_v52, 1 }
 0x343   :  { %v134_v55 = vadd.f32 %v133_v53, %v132_v52 }
 0x345   :  { %v135_v56 = vadd.f32 %v134_v55, %v126_v54 }
 0x347   :  { %137 = vst.msk [vmem:[#allocation2] sm:$0x1] %vm33_vm1, %v135_v56 }
 0x34e   :  { %v145_v57 = vld [vmem:[#allocation2] sm:$0x1] }
 0x34f   :  { %v146_v58 = vmul.f32 -0.125, %v145_v57  ;;  %v147_v59 = vmul.f32 1.442695, %v145_v57 }
 0x351   :  { %193 = vpow2.f32 %v147_v59  ;;  %154 = vperm.xlu0 %186, %v146_v58  }
 0x35b   :  { %v194_v60 = vpop.eup %193 }
 0x35c   :  { %163 = vperm.xlu1 %185, %v194_v60  }
 0x3d0   :  { %v155_v63 = vpop.permute.xlu0 %154 }
 0x3d1   :  { %v160_v1 = vrot.slane %v155_v63, %v159_v62 }
 0x3db   :  { %v164_v0 = vpop.permute.xlu1 %163 }
 0x3dc   :  { %v169_v2 = vrot.slane %v164_v0, %v159_v62 }
 0x3de   :  { %v170_v3 = vsel %vm151_vm7, %v160_v1, %v169_v2 }
 0x3df   :  { %171 = vst [vmem:[%s279_s3] sm:$0x1] %v170_v3 }
 0x3e0   :  { %176 = vsyncpa [#allocation6], 1 }

</bundles_post_ra>
